<compile_context>
chip_gen: v7x
topology: tpu7x:2x2x1
jax: 0.10.0
libtpu: 0.0.40
codegen_flags: <defaults>
</compile_context>

<pallas_src>
import functools

import jax
import jax.numpy as jnp
from jax.experimental import pallas as pl
from jax.experimental.pallas import tpu as pltpu

_EPS = 1e-5  # nn.GroupNorm default eps
_LANES = 128


def _groupnorm_kernel(x_ref, gamma_ref, beta_ref, o_ref, *, n_valid, pad_elems):
    # x_ref / o_ref: (C, HWp) for one sample; gamma_ref / beta_ref: (C, 1) f32.
    # Pass 1: mean.  Padding (if any) is exactly zero, so no mask is needed.
    mean = jnp.sum(x_ref[...].astype(jnp.float32)) / n_valid
    # Pass 2: centered variance (numerically safer than E[x^2] - mean^2); each
    # of the pad_elems zero elements contributes (0 - mean)^2 = mean^2, removed
    # as a scalar correction instead of an element mask.
    d = x_ref[...].astype(jnp.float32) - mean
    ssq = jnp.sum(d * d)
    if pad_elems:
        ssq = ssq - pad_elems * (mean * mean)
    inv = jax.lax.rsqrt(ssq / n_valid + _EPS)
    # Fold mean and inv into the per-channel affine: one FMA per element with a
    # lane-broadcast (C, 1) scale/shift; x is re-read from the resident input
    # buffer so no block-sized centered value is kept live for the store.
    scale = gamma_ref[...] * inv            # (C, 1)
    shift = beta_ref[...] - mean * scale    # (C, 1)
    o_ref[...] = (x_ref[...].astype(jnp.float32) * scale + shift).astype(o_ref.dtype)


def groupnorm1(x_nchw, gamma, beta):
    """GroupNorm(num_groups=1, num_channels=C) on NCHW input via Pallas."""
    N, C, H, W = x_nchw.shape
    hw = H * W
    n_valid = C * hw
    hwp = ((hw + _LANES - 1) // _LANES) * _LANES
    pad = hwp - hw

    # Reshape is metadata-only; only a non-lane-aligned H*W pays a pad pass.
    x3 = x_nchw.reshape(N, C, hw)
    if pad:
        # TODO(synk): for static non-aligned shapes, pad once at model init
        # instead of per call.  Zero fill is load-bearing for the mask-free
        # statistics in the kernel.
        x3 = jnp.pad(x3, ((0, 0), (0, 0), (0, pad)))

    # Tiny per-channel affine columns (f32); lane-broadcast inside the kernel.
    gamma_col = gamma.astype(jnp.float32).reshape(C, 1)
    beta_col = beta.astype(jnp.float32).reshape(C, 1)

    # VMEM budget: x in + out double-buffered plus ~2 block-sized f32
    # temporaries (upcast / centered reduce operand) plus headroom.  Cap per
    # generation: ~40 MiB on 64 MiB-VMEM parts (v7x), ~96 MiB on 128 MiB parts
    # (v5e / v6e).
    itemsize = jnp.dtype(x_nchw.dtype).itemsize
    block_bytes = C * hwp * itemsize
    need = 4 * block_bytes + 2 * C * hwp * 4 + (4 << 20)
    try:
        phys = pltpu.get_tpu_info().vmem_capacity_bytes
    except Exception:
        phys = 64 << 20  # conservative fallback
    cap = (40 << 20) if phys <= (64 << 20) else (96 << 20)
    vmem_limit = int(min(max(need, 16 << 20), cap))
    # TODO(synk): if `need` exceeds `cap` (very large C*H*W), switch to a tiled
    # two-pass reduction over a second ("arbitrary") grid axis instead of a
    # whole-sample-resident block.

    kernel = functools.partial(_groupnorm_kernel,
                               n_valid=n_valid, pad_elems=C * pad)

    out = pl.pallas_call(
        kernel,
        out_shape=jax.ShapeDtypeStruct((N, C, hwp), x_nchw.dtype),
        grid_spec=pl.GridSpec(
            grid=(N,),
            in_specs=[
                pl.BlockSpec((None, C, hwp), lambda i: (i, 0, 0)),
                pl.BlockSpec((C, 1), lambda i: (0, 0)),  # constant idx -> resident
                pl.BlockSpec((C, 1), lambda i: (0, 0)),  # constant idx -> resident
            ],
            out_specs=pl.BlockSpec((None, C, hwp), lambda i: (i, 0, 0)),
        ),
        compiler_params=pltpu.CompilerParams(
            # TODO(synk): for N == 1 on v7x this leaves one TensorCore idle;
            # split rows over a second grid axis with cross-step stats
            # accumulation if that shape matters.
            dimension_semantics=("parallel",),
            vmem_limit_bytes=vmem_limit,
        ),
    )(x3, gamma_col, beta_col)

    if pad:
        out = out[:, :, :hw]
    return out.reshape(N, C, H, W)


def pre_norm(x_nchw, gamma, beta, fn=lambda y: y):
    """PreNorm.forward: fn(GroupNorm(1, dim)(x)).

    `fn` is an arbitrary user-supplied module in the PyTorch code; it is kept
    as a plain-JAX callable here (identity by default).
    """
    # TODO(synk): `fn` is opaque in the reference module; only the norm hot
    # path is a Pallas kernel.
    return fn(groupnorm1(x_nchw, gamma, beta))


if __name__ == "__main__":
    key = jax.random.PRNGKey(0)
    k_x, k_g, k_b = jax.random.split(key, 3)

    N, C, H, W = 2, 4, 16, 16
    x = jax.random.normal(k_x, (N, C, H, W), dtype=jnp.float32)
    # nn.GroupNorm initializes weight=1, bias=0; perturb deterministically so
    # the affine path is actually exercised.
    gamma = jnp.ones((C,), jnp.float32) + 0.1 * jax.random.normal(k_g, (C,))
    beta = jnp.zeros((C,), jnp.float32) + 0.1 * jax.random.normal(k_b, (C,))

    out = jax.block_until_ready(pre_norm(x, gamma, beta))

    # Reference check in plain JAX (GroupNorm with one group).
    xf = x.reshape(N, -1)
    mean = xf.mean(axis=1).reshape(N, 1, 1, 1)
    var = xf.var(axis=1).reshape(N, 1, 1, 1)
    ref = (x - mean) / jnp.sqrt(var + _EPS)
    ref = ref * gamma.reshape(1, C, 1, 1) + beta.reshape(1, C, 1, 1)

    assert out.shape == (N, C, H, W)
    assert jnp.allclose(out, ref, atol=1e-5, rtol=1e-5)
    print("KERNEL_OK")
</pallas_src>

<mosaic_0001>
module attributes {stable_mosaic.version = 11 : i64} {
  func.func @_groupnorm_kernel(%arg0: i32, %arg1: memref<1x4x256xf32, #tpu.memory_space<vmem>>, %arg2: memref<4x1xf32, #tpu.memory_space<vmem>>, %arg3: memref<4x1xf32, #tpu.memory_space<vmem>>, %arg4: memref<1x4x256xf32, #tpu.memory_space<vmem>>) attributes {dimension_semantics = [#tpu.dimension_semantics<parallel>], iteration_bounds = array<i64: 2>, scalar_prefetch = 0 : i64, scratch_operands = 0 : i64, tpu.core_type = #tpu.core_type<tc>, window_params = [{transform_indices = @transform_0, window_bounds = array<i64: 1, 4, 256>}, {pipeline_mode = #tpu.pipeline_mode<synchronous>, transform_indices = @transform_1, window_bounds = array<i64: 4, 1>}, {pipeline_mode = #tpu.pipeline_mode<synchronous>, transform_indices = @transform_2, window_bounds = array<i64: 4, 1>}, {transform_indices = @transform_3, window_bounds = array<i64: 1, 4, 256>}]} {
    %c0 = arith.constant 0 : index
    %c0_0 = arith.constant 0 : index
    %c0_1 = arith.constant 0 : index
    %0 = vector.load %arg1[%c0, %c0_0, %c0_1] : memref<1x4x256xf32, #tpu.memory_space<vmem>>, vector<1x4x256xf32>
    %1 = vector.shape_cast %0 : vector<1x4x256xf32> to vector<4x256xf32>
    %2 = vector.shape_cast %1 : vector<4x256xf32> to vector<1x4x256xf32>
    %cst = arith.constant dense<0.000000e+00> : vector<1xf32>
    %3 = vector.multi_reduction <add>, %2, %cst [1, 2] : vector<1x4x256xf32> to vector<1xf32>
    %4 = vector.shape_cast %3 : vector<1xf32> to vector<1x1x1xf32>
    %5 = vector.extract %4[0, 0, 0] : f32 from vector<1x1x1xf32>
    %cst_2 = arith.constant 1.024000e+03 : f32
    %6 = arith.divf %5, %cst_2 : f32
    %c0_3 = arith.constant 0 : index
    %c0_4 = arith.constant 0 : index
    %c0_5 = arith.constant 0 : index
    %7 = vector.load %arg1[%c0_3, %c0_4, %c0_5] : memref<1x4x256xf32, #tpu.memory_space<vmem>>, vector<1x4x256xf32>
    %8 = vector.shape_cast %7 : vector<1x4x256xf32> to vector<4x256xf32>
    %9 = vector.broadcast %6 : f32 to vector<4x256xf32>
    %10 = arith.subf %8, %9 : vector<4x256xf32>
    %11 = arith.mulf %10, %10 : vector<4x256xf32>
    %12 = vector.shape_cast %11 : vector<4x256xf32> to vector<1x4x256xf32>
    %cst_6 = arith.constant dense<0.000000e+00> : vector<1xf32>
    %13 = vector.multi_reduction <add>, %12, %cst_6 [1, 2] : vector<1x4x256xf32> to vector<1xf32>
    %14 = vector.shape_cast %13 : vector<1xf32> to vector<1x1x1xf32>
    %15 = vector.extract %14[0, 0, 0] : f32 from vector<1x1x1xf32>
    %cst_7 = arith.constant 1.024000e+03 : f32
    %16 = arith.divf %15, %cst_7 : f32
    %cst_8 = arith.constant 9.99999974E-6 : f32
    %17 = arith.addf %16, %cst_8 : f32
    %18 = math.rsqrt %17 : f32
    %c0_9 = arith.constant 0 : index
    %c0_10 = arith.constant 0 : index
    %19 = vector.load %arg2[%c0_9, %c0_10] : memref<4x1xf32, #tpu.memory_space<vmem>>, vector<4x1xf32>
    %20 = vector.broadcast %18 : f32 to vector<4x1xf32>
    %21 = arith.mulf %19, %20 : vector<4x1xf32>
    %c0_11 = arith.constant 0 : index
    %c0_12 = arith.constant 0 : index
    %22 = vector.load %arg3[%c0_11, %c0_12] : memref<4x1xf32, #tpu.memory_space<vmem>>, vector<4x1xf32>
    %23 = vector.broadcast %6 : f32 to vector<4x1xf32>
    %24 = arith.mulf %23, %21 : vector<4x1xf32>
    %25 = arith.subf %22, %24 : vector<4x1xf32>
    %c0_13 = arith.constant 0 : index
    %c0_14 = arith.constant 0 : index
    %c0_15 = arith.constant 0 : index
    %26 = vector.load %arg1[%c0_13, %c0_14, %c0_15] : memref<1x4x256xf32, #tpu.memory_space<vmem>>, vector<1x4x256xf32>
    %27 = vector.shape_cast %26 : vector<1x4x256xf32> to vector<4x256xf32>
    %28 = vector.broadcast %21 : vector<4x1xf32> to vector<4x256xf32>
    %29 = arith.mulf %27, %28 : vector<4x256xf32>
    %30 = vector.broadcast %25 : vector<4x1xf32> to vector<4x256xf32>
    %31 = arith.addf %29, %30 : vector<4x256xf32>
    %c0_16 = arith.constant 0 : index
    %c0_17 = arith.constant 0 : index
    %c0_18 = arith.constant 0 : index
    %32 = vector.load %arg4[%c0_16, %c0_17, %c0_18] : memref<1x4x256xf32, #tpu.memory_space<vmem>>, vector<1x4x256xf32>
    %33 = vector.shape_cast %32 : vector<1x4x256xf32> to vector<4x256xf32>
    %34 = vector.shape_cast %31 : vector<4x256xf32> to vector<1x4x256xf32>
    tpu.vector_store %arg4[%c0_16, %c0_17, %c0_18], %34 {strides = array<i32>} : memref<1x4x256xf32, #tpu.memory_space<vmem>>, vector<1x4x256xf32>,
    return
  }
  func.func @transform_0(%arg0: i32) -> (i32, i32, i32) {
    %c0_i32 = arith.constant 0 : i32
    %c0_i32_0 = arith.constant 0 : i32
    %c0_i32_1 = arith.constant 0 : i32
    return %arg0, %c0_i32, %c0_i32_0 : i32, i32, i32
  }
  func.func @transform_1(%arg0: i32) -> (i32, i32) {
    %c0_i32 = arith.constant 0 : i32
    %c0_i32_0 = arith.constant 0 : i32
    %c0_i32_1 = arith.constant 0 : i32
    return %c0_i32, %c0_i32_0 : i32, i32
  }
  func.func @transform_2(%arg0: i32) -> (i32, i32) {
    %c0_i32 = arith.constant 0 : i32
    %c0_i32_0 = arith.constant 0 : i32
    %c0_i32_1 = arith.constant 0 : i32
    return %c0_i32, %c0_i32_0 : i32, i32
  }
  func.func @transform_3(%arg0: i32) -> (i32, i32, i32) {
    %c0_i32 = arith.constant 0 : i32
    %c0_i32_0 = arith.constant 0 : i32
    %c0_i32_1 = arith.constant 0 : i32
    return %arg0, %c0_i32, %c0_i32_0 : i32, i32, i32
  }
}

</mosaic_0001>

<bundles_post_ra>
// kernel: tpu_custom_call.1
= control target key start
LH: loop header
LB: loop body
LE: loop exit
PB: predicated region body
PF: predicated region fallthrough
CT: control target
= control target key end

     0   :  { %8 = vsyncpa [#allocation3], 0  ;;  %s729_s0 = inlined_call_operand.hbm [shape: f32[2,4,256], index: 0, kind: input, shape index: {}]   ;;  %s730_s1 = inlined_call_operand.vmem [shape: f32[4,1], index: 1, kind: input, shape index: {}]   ;;  %s731_s2 = inlined_call_operand.vmem [shape: f32[4,1], index: 2, kind: input, shape index: {}]   ;;  %s732_s3 = inlined_call_operand.hbm [shape: f32[2,4,256], index: 3, kind: output, shape index: {}]  }
   0x1   :  { %10 = vsyncpa [#allocation3 + $0x1], 0 }
   0x2   :  { %11 = vsyncpa [#allocation4], 0 }
   0x3   :  { %13 = vsyncpa [#allocation4 + $0x1], 0  ;;  %s547_s12 = smov 0   ;;  %s549_s13 = smov 0  }
   0x4   :  { %s551_s14 = smov 0   ;;  %s553_s15 = smov 0  }
   0x5 LB: > { %s568_s16 = sadd.s32 4294967295, %s521_s15   ;;  %s350_s17 = sadd.s32 4294967294, %s521_s15   ;;  %s521_s15 = sphi %s553_s15, %s747_s15   ;;  %s517_s14 = sphi %s551_s14, %s746_s14   ;;  %s513_s13 = sphi %s549_s13, %s745_s13   ;;  %s509_s12 = sphi %s547_s12, %s744_s12  }
   0x6   : > { %s572_s18 = sadd.s32 1, %s521_s15   ;;  %s26_s19 = sadd.s32 1, %s517_s14 }
   0x7   : > { %s23_s20 = ssub.s32 %s521_s15, %s572_s18  ;;  %p33_p0 = scmp.ne.s32.totalorder %s517_s14, %s513_s13 }
   0x8   : > { %p24_p1 = scmp.eq.s32.totalorder %s23_s20, 0  ;;  %p34_p2 = scmp.eq.s32.totalorder %s521_s15, 0 }
   0x9   : > { %p39_p3 = scmp.ne.s32.totalorder %s513_s13, %s509_s12  ;;  %p40_p4 = scmp.eq.s32.totalorder %s568_s16, 0 }
   0xa   : > { %s584_s21 = scalar_select %p24_p1, %s517_s14, %s26_s19  }
   0xb   : > { %p586_p5 = por %p34_p2, %p33_p0  ;;  %p590_p6 = por %p40_p4, %p39_p3 }
   0xc   : > { %p105_p7 = scmp.eq.s32.totalorder %s568_s16, 1  ;;  %p111_p8 = scmp.eq.s32.totalorder %s350_s17, 1 }
   0xd   : > { %p384_p10 = scmp.lt.s32.totalorder %s521_s15, 2  ;;  %s137_s26 = sand.u32 1, %s517_s14  }
   0xe   : > { %p597_p11 = por %p105_p7, %p33_p0  ;;  %p601_p12 = por %p111_p8, %p39_p3 }
   0xf   : > { %s364_s27 = sshll.u32 %s521_s15, 7  ;;  %s353_s28 = sshll.u32 %s137_s26, 3 }
  0x10   : > { %s736_s24 = scalar_select %p597_p11, 1, 0 }
  0x11   : > { %s737_s25 = scalar_select %p601_p12, 1, 0 }
  0x12   : > { %s610_s4 = scalar_lea.hbm %s729_s0, %s364_s27  ;;  %s141_s5 = scalar_lea.vmem [#allocation2], %s353_s28 }
  0x13   : > { %s149_s6 = sshll.u32 %s141_s5, 4  ;;  %p614_p13 = pnand %p384_p10, %p586_p5  ;;  %s618_s6 = int_to_ptr.vmem [resolvable:$true] %s149_s6 }
  0x14   : > { %s138_s8 = scalar_lea.sflag [#allocation3], %s137_s26  ;;  %s425_s9 = scalar_lea.hbm %s610_s4, 128 }
  0x15   : > { %p426_p2 = scmp.ne.s32.totalorder %s610_s4, %s425_s9  ;;  %p427_p3 = pneg %p614_p13 }
  0x16   : > { %s430_s17 = scalar_lea.hbm %s729_s0, 256  ;;  %p431_p5 = scmp.lt.u32.totalorder %s610_s4, %s729_s0 }
  0x17   : > { %p428_p4 = pnand %p427_p3, %p426_p2  ;;  %p432_p8 = scmp.lt.u32.totalorder %s430_s17, %s425_s9 }
  0x18   : > { %p434_p9 = scmp.lt.u32.totalorder %s425_s9, %s610_s4 }
  0x19   : > { %p429_p7 = pneg %p428_p4  ;;  %p433_p10 = por %p432_p8, %p431_p5 }
  0x1b   : > { %p435_p0 = por %p434_p9, %p433_p10 }
  0x1d   : > { %p436_p1 = pnand %p435_p0, %p429_p7 }
  0x1f   : > { %439 = shalt.err (!%p436_p1)
}
  0x20   : > { %s440_s22 = scalar_lea.vmem %s618_s6, 128  ;;  %s523_s26 = smov [#allocation2]  }
  0x21   : > { %p441_p2 = scmp.ne.s32.totalorder %s618_s6, %s440_s22  ;;  %s445_s27 = sshll.u32 %s523_s26, 4  ;;  %s446_s27 = int_to_ptr.vmem [resolvable:$false] %s445_s27 }
  0x22   : > { %s447_s28 = scalar_lea.vmem %s446_s27, 256  ;;  %p448_p11 = scmp.lt.s32.totalorder %s618_s6, %s446_s27 }
  0x23   : > { %p443_p4 = pnand %p441_p2, %p427_p3  ;;  %p449_p5 = scmp.lt.s32.totalorder %s447_s28, %s440_s22 }
  0x25   : > { %p444_p12 = pneg %p443_p4  ;;  %p450_p8 = por %p449_p5, %p448_p11 }
  0x27   : > { %p451_p9 = pnand %p450_p8, %p444_p12 }
  0x29   : > { %454 = shalt.err (!%p451_p9)
}
  0x2a   : > { %379 = dma.hbm_to_vmem [thread:$0]  (!%p614_p13), %s610_s4, 128, %s618_s6, %s138_s8  }
  0x2b   : > { %p739_p0 = scmp.lt.s32.totalorder %s521_s15, 3  ;;  %p740_p1 = scmp.ge.s32.totalorder %s521_s15, 1 }
  0x2d   : > { %p155_p3 = pnand %p740_p1, %p739_p0 }
  0x2e   : > { %s652_s29 = sand.u32 (!%p155_p3), 1, %s513_s13  }
  0x2f   : > { %158 = sbr.rel (%p155_p3) target bundleno = 700 (0x2bc), region = 32  ;;  %s357_s30 = sshll.u32 (!%p155_p3), %s652_s29, 3 }
  0x30   : > { %s161_s5 = scalar_lea.sflag (!%p155_p3), [#allocation3], %s652_s29  ;;  %s164_s7 = scalar_lea.vmem (!%p155_p3), [#allocation2], %s357_s30 }
  0x36   : > { %500 = dma.done.wait (%p590_p6), %s161_s5, 128  }
  0x37   : > { %502 = vsyncadd (%p590_p6), %s161_s5, 4294967168  ;;  %vm191_vm0 = vcmask 1043456   ;;  %v662_v0 = vld [vmem:[%s164_s7] sm:$0xff]  ;;  %v524_v22 = vmov 0   ;;  %v525_v35 = vmov 839922192   ;;  %v245_v37 = vlaneseq }
  0x38   : > { %v189_v1 = vcombine.high %v662_v0, %v662_v0  ;;  %v192_v2 = vsel %vm191_vm0, %v662_v0, 0.0  ;;  %420 = vset.pattern.permute.xlu1 %v524_v22  ;;  %421 = vset.pattern.permute.xlu0 %v524_v22  ;;  %v232_v29 = vld [vmem:[%s730_s1] sm:$0xf]  ;;  %v243_v36 = vunpack.c.l.s4 %v525_v35  ;;  %s365_s22 = sshll.u32 %s568_s16, 7  ;;  %s186_s26 = scalar_lea.vmem [#allocation5], %s357_s30 }
  0x39   : > { %v235_v32 = vld [vmem:[%s731_s2] sm:$0xf]  ;;  %v246_v39 = vshrl.u32 %v245_v37, 7  ;;  %s280_s27 = sshll.u32 %s186_s26, 4  ;;  %s685_s7 = scalar_lea.hbm %s732_s3, %s365_s22  ;;  %s687_s27 = int_to_ptr.vmem [resolvable:$true] %s280_s27 }
  0x3a   : > { %v193_v3 = vsel %vm191_vm0, %v189_v1, 0.0  ;;  %v244_v38 = vunpack.c.0.s8 %v243_v36  ;;  %s455_s16 = scalar_lea.vmem %s687_s27, 128  ;;  %p741_p11 = scmp.ne.s32.totalorder %s736_s24, 0 }
  0x3b   : > { %v194_v4 = vadd.f32 %v193_v3, %v192_v2  ;;  %p456_p6 = scmp.ne.s32.totalorder %s687_s27, %s455_s16  ;;  %s526_s30 = smov [#allocation5]  }
  0x3c   : > { %v247_v40 = vsub.s32 %v244_v38, %v246_v39 }
  0x3d   : > { %195 = vadd.xlane.f32.xlu0 %v194_v4  ;;  %p457_p12 = pnand %p456_p6, %p741_p11 }
  0x3f   : > { %p458_p13 = pneg %p457_p12 }
  0xca   : > { %v196_v5 = vpop.xlane.xlu0 %195 }
  0xcb   : > { %v197_v6 = vrot.slane %v196_v5, 4 }
  0xcd   : > { %v198_v7 = vadd.f32 %v197_v6, %v196_v5 }
  0xcf   : > { %v199_v8 = vrot.slane %v198_v7, 2 }
  0xd1   : > { %v200_v9 = vadd.f32 %v199_v8, %v198_v7 }
  0xd3   : > { %v201_v10 = vrot.slane %v200_v9, 1 }
  0xd5   : > { %v202_v11 = vadd.f32 %v201_v10, %v200_v9 }
  0xd7   : > { %366 = vpush %v202_v11 }
 0x108   : > { %s367_s23 = spop %366 }
 0x109   : > { %s206_s4 = smul.f32 0.0009765625, %s367_s23  ;;  %s266_s23 = scalar_lea.sflag [#allocation4], %s652_s29 }
 0x10b   : > { %v207_v12 = vstv %s206_s4  ;;  %s459_s4 = sshll.u32 %s526_s30, 4  ;;  %s460_s4 = int_to_ptr.vmem [resolvable:$false] %s459_s4 }
 0x10c   : > { %v208_v13 = vsub.f32 %v662_v0, %v207_v12  ;;  %p462_p7 = scmp.lt.s32.totalorder %s687_s27, %s460_s4 }
 0x10e   : > { %v209_v14 = vmul.f32 %v208_v13, %v208_v13 }
 0x110   : > { %v211_v15 = vcombine.high %v209_v14, %v209_v14  ;;  %v213_v16 = vsel %vm191_vm0, %v209_v14, 0.0 }
 0x112   : > { %v214_v17 = vsel %vm191_vm0, %v211_v15, 0.0 }
 0x113   : > { %v215_v18 = vadd.f32 %v214_v17, %v213_v16 }
 0x115   : > { %216 = vadd.xlane.f32.xlu0 %v215_v18 }
 0x1a2   : > { %v217_v19 = vpop.xlane.xlu0 %216 }
 0x1a3   : > { %v218_v20 = vrot.slane %v217_v19, 4 }
 0x1a5   : > { %v219_v21 = vadd.f32 %v218_v20, %v217_v19 }
 0x1a7   : > { %v220_v23 = vrot.slane %v219_v21, 2 }
 0x1a9   : > { %v221_v24 = vadd.f32 %v220_v23, %v219_v21 }
 0x1ab   : > { %v222_v25 = vrot.slane %v221_v24, 1 }
 0x1ad   : > { %v223_v26 = vadd.f32 %v222_v25, %v221_v24 }
 0x1af   : > { %368 = vpush %v223_v26 }
 0x1e0   : > { %s369_s6 = spop %368 }
 0x1e1   : > { %s227_s8 = smul.f32 0.0009765625, %s369_s6  ;;  %s461_s6 = scalar_lea.vmem %s460_s4, 256 }
 0x1e2   : > { %p463_p10 = scmp.lt.s32.totalorder %s461_s6, %s455_s16 }
 0x1e3   : > { %s228_s9 = sadd.f32 1e-05, %s227_s8 }
 0x1e4   : > { %p464_p2 = por %p463_p10, %p462_p7 }
 0x1e5   : > { %v229_v27 = vstv %s228_s9 }
 0x1e6   : > { %423 = vrsqrt.f32 %v229_v27  ;;  %p465_p4 = pnand %p464_p2, %p458_p13 }
 0x1f0   : > { %v424_v28 = vpop.eup %423 }
 0x1f1   : > { %370 = vpush %v424_v28 }
 0x222   : > { %s371_s17 = spop %370 }
 0x223   : > { %v233_v30 = vstv %s371_s17 }
 0x224   : > { %v234_v31 = vmul.f32 %v233_v30, %v232_v29 }
 0x226   : > { %v236_v33 = vmul.f32 %v234_v31, %v207_v12  ;;  %240 = vperm.xlu1 %420, %v234_v31  }
 0x228   : > { %v237_v34 = vsub.f32 %v235_v32, %v236_v33 }
 0x22a   : > { %253 = vperm.xlu1 %420, %v237_v34  }
 0x2a5   : > { %v241_v41 = vpop.permute.xlu1 %240 }
 0x2a6   : > { %v248_v42 = vrot.slane %v241_v41, %v247_v40 }
 0x2a8   : > { %v250_v44 = vmul.f32 %v248_v42, %v662_v0 }
 0x2a9   : > { %v254_v43 = vpop.permute.xlu1 %253 }
 0x2aa   : > { %v261_v45 = vrot.slane %v254_v43, %v247_v40 }
 0x2ac   : > { %v263_v46 = vadd.f32 %v261_v45, %v250_v44 }
 0x2ae   : > { %264 = vst [vmem:[%s186_s26] sm:$0xff] %v263_v46 }
 0x2af   : > { %468 = shalt.err (!%p465_p4)
}
 0x2b0   : > { %s469_s29 = scalar_lea.hbm %s685_s7, 128  ;;  %s473_s10 = scalar_lea.hbm %s732_s3, 256 }
 0x2b1   : > { %p470_p5 = scmp.ne.s32.totalorder %s685_s7, %s469_s29  ;;  %p474_p0 = scmp.lt.u32.totalorder %s685_s7, %s732_s3 }
 0x2b2   : > { %p475_p1 = scmp.lt.u32.totalorder %s473_s10, %s469_s29  ;;  %p477_p6 = scmp.lt.u32.totalorder %s469_s29, %s685_s7 }
 0x2b3   : > { %p471_p8 = pnand %p470_p5, %p741_p11 }
 0x2b4   : > { %p476_p3 = por %p475_p1, %p474_p0 }
 0x2b5   : > { %p472_p9 = pneg %p471_p8 }
 0x2b6   : > { %p478_p12 = por %p477_p6, %p476_p3 }
 0x2b8   : > { %p479_p13 = pnand %p478_p12, %p472_p9 }
 0x2ba   : > { %482 = shalt.err (!%p479_p13)
}
 0x2bb   : > { %374 = dma.vmem_to_hbm [thread:$0]  (%p741_p11), %s687_s27, 128, %s685_s7, %s266_s23  }
 0x2bc PF: > { %s292_s19 = sand.u32 1, %s509_s12   ;;  %p742_p7 = scmp.ne.s32.totalorder %s737_s25, 0 }
 0x2bd   : > { %p743_p10 = scmp.ge.s32.totalorder %s521_s15, 2  ;;  %s293_s20 = scalar_lea.sflag [#allocation4], %s292_s19 }
 0x2bf   : > { %p381_p2 = pnand %p743_p10, %p742_p7 }
 0x2c1   : > { %504 = dma.done.wait (!%p381_p2), %s293_s20, 128  }
 0x2c2   : > { %506 = vsyncadd (!%p381_p2), %s293_s20, 4294967168  ;;  %p16_p4 = scmp.ge.s32.totalorder %s572_s18, 4   ;;  %s744_s12 = smov %s513_s13 }
 0x2c3   : > { %s745_s13 = smov %s517_s14  ;;  %s746_s14 = smov %s584_s21 }
 0x2c4   : > { %s747_s15 = smov %s572_s18  ;;  %18 = sbr.rel (!%p16_p4) target bundleno = 5 (0x5), region = 77 }
 0x2cb   :  { %298 = vsyncpa [#allocation3], 1 }
 0x2cc   :  { %300 = vsyncpa [#allocation3 + $0x1], 1 }
 0x2cd   :  { %301 = vsyncpa [#allocation4], 1 }
 0x2ce   :  { %303 = vsyncpa [#allocation4 + $0x1], 1 }

</bundles_post_ra>
